<compile_context>
chip_gen: v7x
topology: tpu7x:2x2x1
jax: 0.10.0
libtpu: 0.0.40
codegen_flags: <defaults>
</compile_context>

<pallas_src>
import functools

import jax
import jax.numpy as jnp
from jax.experimental import pallas as pl
from jax.experimental.pallas import tpu as pltpu


def _downsample_kernel(x_ref, w_ref, b_ref, o_ref):
    # 1x1 conv (BN scale folded into W) == channel matmul on the MXU; the BN
    # shift is a per-output-channel bias added after f32 accumulation.
    x = x_ref[...].astype(jnp.bfloat16)   # no-op when the input is already bf16
    acc = jnp.dot(w_ref[...], x, preferred_element_type=jnp.float32)
    o_ref[...] = (acc + b_ref[...]).astype(o_ref.dtype)


def _round_up(v, m):
    return ((v + m - 1) // m) * m


@functools.partial(jax.jit, static_argnames=("stride", "eps", "out_dtype"))
def downsample_bottleneck(x_nchw, conv_w, gamma, beta, running_mean,
                          running_var, *, stride=2, eps=1e-5,
                          out_dtype=jnp.bfloat16):
    """Conv2d(1x1, stride, bias=False) + BatchNorm2d (eval) on NCHW input."""
    N, Cin, H, W = x_nchw.shape
    Cout = conv_w.shape[0]
    Ho = (H - 1) // stride + 1
    Wo = (W - 1) // stride + 1
    Mo = Ho * Wo

    # ---- fold BatchNorm (eval) into the conv weight + per-channel bias -----
    # Fold kept in f32; only the final operands are cast to bf16.
    scale = gamma / jnp.sqrt(running_var + eps)                   # (Cout,)
    bias2d = (beta - running_mean * scale).astype(jnp.float32).reshape(Cout, 1)
    w2d = (conv_w.reshape(Cout, Cin) * scale[:, None]).astype(jnp.bfloat16)

    # ---- input staging ------------------------------------------------------
    if stride == 1:
        # Free (contiguous) reshape only: the kernel streams the f32 NCHW
        # input directly from HBM and casts on the VPU.  No pre-pass, no
        # intermediate HBM write/read.
        xs = x_nchw.reshape(N, Cin, Mo)
    else:
        # TODO(synk): fold this strided subsample into the kernel DMA (per-
        # output-row index_map + in-kernel lane subsample).  Lane-strided
        # selects / gathers are not robustly lowered by Mosaic today, so the
        # H/W stride stays as one fused XLA gather+cast pass; the bf16
        # intermediate it writes is Cin*Ho*Wo*2 bytes (1/8 of the f32 input at
        # stride 2), so the kernel itself still reads the minimum.
        xs = x_nchw[:, :, ::stride, ::stride].reshape(N, Cin, Mo).astype(
            jnp.bfloat16)

    # ---- tiling -------------------------------------------------------------
    # Lane dim of the x/out blocks is the flattened output spatial dim.  Use
    # the full extent (one fat, lane-dense step per image) unless it is large;
    # if N == 1, still split the spatial axis so the grid has >= 2 parallel
    # steps for v7x's two TensorCores.
    tm = Mo if Mo <= 2048 else 2048
    if N == 1 and Mo > 256:
        tm = min(tm, _round_up(pl.cdiv(Mo, 2), 128))

    grid = (N, pl.cdiv(Mo, tm))

    flops = 2 * N * Cout * Cin * Mo
    bytes_accessed = (xs.size * xs.dtype.itemsize
                      + w2d.size * 2
                      + bias2d.size * 4
                      + N * Cout * Mo * jnp.dtype(out_dtype).itemsize)

    out3d = pl.pallas_call(
        _downsample_kernel,
        out_shape=jax.ShapeDtypeStruct((N, Cout, Mo), out_dtype),
        grid_spec=pltpu.PrefetchScalarGridSpec(
            num_scalar_prefetch=0,
            grid=grid,
            in_specs=[
                # Activations: one (Cin, tm) channel-major tile per step.
                pl.BlockSpec((None, Cin, tm), lambda n, i: (n, 0, i)),
                # Folded weight: fully resident (same block every step).
                pl.BlockSpec((Cout, Cin), lambda n, i: (0, 0)),
                # Folded BN bias: fully resident.
                pl.BlockSpec((Cout, 1), lambda n, i: (0, 0)),
            ],
            out_specs=pl.BlockSpec((None, Cout, tm), lambda n, i: (n, 0, i)),
        ),
        compiler_params=pltpu.CompilerParams(
            # No reduction axis (full Cin contraction per block) -> both axes
            # are parallel and can shard across TensorCores.
            dimension_semantics=("parallel", "parallel"),
            # Worst-case resident blocks (ResNet layer4 shapes) are ~11 MiB
            # double-buffered; 48 MiB leaves pipelining headroom and still
            # fits v7x's 64 MiB physical VMEM.
            vmem_limit_bytes=48 * 1024 * 1024,
        ),
        cost_estimate=pl.CostEstimate(
            flops=flops, transcendentals=0, bytes_accessed=bytes_accessed),
    )(xs, w2d, bias2d)

    # Output is already channel-major (NCHW); this reshape is free.
    return out3d.reshape(N, Cout, Ho, Wo)


def _reference(x, conv_w, gamma, beta, mean, var, stride, eps=1e-5):
    y = jax.lax.conv_general_dilated(
        x, conv_w, window_strides=(stride, stride), padding="VALID",
        dimension_numbers=("NCHW", "OIHW", "NCHW"))
    inv = gamma / jnp.sqrt(var + eps)
    return (y * inv[None, :, None, None]
            + (beta - mean * inv)[None, :, None, None])


if __name__ == "__main__":
    # (N, Cin, H, W, Cout, stride)
    configs = [
        (2, 4, 16, 16, 8, 2),       # tiny sanity config (matches module scale)
        (2, 128, 14, 14, 256, 2),   # Mo=49: non-128 lane width / masked stores
        (1, 64, 30, 30, 128, 1),    # stride-1 zero-copy path, N==1 M-split,
                                    # partial trailing spatial tile (900 -> 512+388)
    ]

    key = jax.random.PRNGKey(0)
    for cfg in configs:
        N, Cin, H, W, Cout, stride = cfg
        key, kx, kw, kg, kb, km, kv = jax.random.split(key, 7)

        x = jax.random.normal(kx, (N, Cin, H, W), dtype=jnp.float32)
        conv_w = jax.random.normal(kw, (Cout, Cin, 1, 1), dtype=jnp.float32) * 0.1
        gamma = 1.0 + 0.1 * jax.random.normal(kg, (Cout,), dtype=jnp.float32)
        beta = 0.1 * jax.random.normal(kb, (Cout,), dtype=jnp.float32)
        running_mean = 0.1 * jax.random.normal(km, (Cout,), dtype=jnp.float32)
        running_var = jnp.abs(1.0 + 0.1 * jax.random.normal(
            kv, (Cout,), dtype=jnp.float32))

        out = downsample_bottleneck(x, conv_w, gamma, beta, running_mean,
                                    running_var, stride=stride)
        out = jax.block_until_ready(out)

        Ho = (H - 1) // stride + 1
        Wo = (W - 1) // stride + 1
        assert out.shape == (N, Cout, Ho, Wo), (cfg, out.shape)

        ref = _reference(x, conv_w, gamma, beta, running_mean, running_var,
                         stride)
        out_f32 = out.astype(jnp.float32)
        max_err = float(jnp.max(jnp.abs(out_f32 - ref)))
        # bf16 activations/weights/output (f32 accumulation) vs f32 reference.
        assert jnp.allclose(out_f32, ref, atol=3e-2, rtol=3e-2), (cfg, max_err)

    print("KERNEL_OK")
</pallas_src>

<mosaic_0001>
module attributes {stable_mosaic.version = 11 : i64} {
  func.func @_downsample_kernel(%arg0: i32, %arg1: i32, %arg2: memref<1x4x64xbf16, #tpu.memory_space<vmem>>, %arg3: memref<8x4xbf16, #tpu.memory_space<vmem>>, %arg4: memref<8x1xf32, #tpu.memory_space<vmem>>, %arg5: memref<1x8x64xbf16, #tpu.memory_space<vmem>>) attributes {dimension_semantics = [#tpu.dimension_semantics<parallel>, #tpu.dimension_semantics<parallel>], iteration_bounds = array<i64: 2, 1>, scalar_prefetch = 0 : i64, scratch_operands = 0 : i64, tpu.core_type = #tpu.core_type<tc>, window_params = [{transform_indices = @transform_0, window_bounds = array<i64: 1, 4, 64>}, {pipeline_mode = #tpu.pipeline_mode<synchronous>, transform_indices = @transform_1, window_bounds = array<i64: 8, 4>}, {pipeline_mode = #tpu.pipeline_mode<synchronous>, transform_indices = @transform_2, window_bounds = array<i64: 8, 1>}, {transform_indices = @transform_3, window_bounds = array<i64: 1, 8, 64>}]} {
    %c0 = arith.constant 0 : index
    %c0_0 = arith.constant 0 : index
    %c0_1 = arith.constant 0 : index
    %0 = vector.load %arg2[%c0, %c0_0, %c0_1] : memref<1x4x64xbf16, #tpu.memory_space<vmem>>, vector<1x4x64xbf16>
    %1 = vector.shape_cast %0 : vector<1x4x64xbf16> to vector<4x64xbf16>
    %c0_2 = arith.constant 0 : index
    %c0_3 = arith.constant 0 : index
    %2 = vector.load %arg3[%c0_2, %c0_3] : memref<8x4xbf16, #tpu.memory_space<vmem>>, vector<8x4xbf16>
    %cst = arith.constant dense<0.000000e+00> : vector<8x64xf32>
    %3 = tpu.matmul %2, %1, %cst {dimension_numbers = #tpu.dot_dimension_numbers<[1], [0], [0], [1], [0, 0, 1, 1], [], []>} : vector<8x4xbf16>, vector<4x64xbf16>, vector<8x64xf32> -> vector<8x64xf32>
    %c0_4 = arith.constant 0 : index
    %c0_5 = arith.constant 0 : index
    %4 = vector.load %arg4[%c0_4, %c0_5] : memref<8x1xf32, #tpu.memory_space<vmem>>, vector<8x1xf32>
    %5 = vector.broadcast %4 : vector<8x1xf32> to vector<8x64xf32>
    %6 = arith.addf %3, %5 : vector<8x64xf32>
    %7 = arith.truncf %6 : vector<8x64xf32> to vector<8x64xbf16>
    %c0_6 = arith.constant 0 : index
    %c0_7 = arith.constant 0 : index
    %c0_8 = arith.constant 0 : index
    %8 = vector.load %arg5[%c0_6, %c0_7, %c0_8] : memref<1x8x64xbf16, #tpu.memory_space<vmem>>, vector<1x8x64xbf16>
    %9 = vector.shape_cast %8 : vector<1x8x64xbf16> to vector<8x64xbf16>
    %10 = vector.shape_cast %7 : vector<8x64xbf16> to vector<1x8x64xbf16>
    tpu.vector_store %arg5[%c0_6, %c0_7, %c0_8], %10 {strides = array<i32>} : memref<1x8x64xbf16, #tpu.memory_space<vmem>>, vector<1x8x64xbf16>,
    return
  }
  func.func @transform_0(%arg0: i32, %arg1: i32) -> (i32, i32, i32) {
    %c0_i32 = arith.constant 0 : i32
    %c0_i32_0 = arith.constant 0 : i32
    return %arg0, %c0_i32, %arg1 : i32, i32, i32
  }
  func.func @transform_1(%arg0: i32, %arg1: i32) -> (i32, i32) {
    %c0_i32 = arith.constant 0 : i32
    %c0_i32_0 = arith.constant 0 : i32
    %c0_i32_1 = arith.constant 0 : i32
    return %c0_i32, %c0_i32_0 : i32, i32
  }
  func.func @transform_2(%arg0: i32, %arg1: i32) -> (i32, i32) {
    %c0_i32 = arith.constant 0 : i32
    %c0_i32_0 = arith.constant 0 : i32
    %c0_i32_1 = arith.constant 0 : i32
    return %c0_i32, %c0_i32_0 : i32, i32
  }
  func.func @transform_3(%arg0: i32, %arg1: i32) -> (i32, i32, i32) {
    %c0_i32 = arith.constant 0 : i32
    %c0_i32_0 = arith.constant 0 : i32
    return %arg0, %c0_i32, %arg1 : i32, i32, i32
  }
}

</mosaic_0001>

<bundles_post_ra>
// kernel: downsample_bottleneck.1
= control target key start
LH: loop header
LB: loop body
LE: loop exit
PB: predicated region body
PF: predicated region fallthrough
CT: control target
= control target key end

     0   :  { %s424_s12 = smov 0   ;;  %s426_s13 = smov 0   ;;  %s463_s0 = inlined_call_operand.vmem [shape: bf16[2,4,64], index: 0, kind: input, shape index: {}]   ;;  %s464_s1 = inlined_call_operand.vmem [shape: bf16[8,4], index: 1, kind: input, shape index: {}]   ;;  %s465_s2 = inlined_call_operand.vmem [shape: f32[8,1], index: 2, kind: input, shape index: {}]   ;;  %s466_s3 = inlined_call_operand.vmem [shape: bf16[2,8,64], index: 3, kind: output, shape index: {}]  }
   0x1   :  { %s428_s14 = smov 0  }
   0x2 LB: > { %s25_s15 = sadd.s32 1, %s395_s13  ;;  %p335_p0 = scmp.ge.s32.totalorder %s399_s14, 1  ;;  %s399_s14 = sphi %s428_s14, %s13_s14   ;;  %s395_s13 = sphi %s426_s13, %s468_s13   ;;  %s391_s12 = sphi %s424_s12, %s467_s12  }
   0x3   : > { %p27_p1 = scmp.ge.s32.totalorder %s25_s15, 2  ;;  %p155_p2 = scmp.lt.s32.totalorder %s399_s14, 3 }
   0x5   : > { %s470_s15 = smov (%p27_p1, %s25_s15), 0  ;;  %p156_p3 = pnand %p335_p0, %p155_p2 }
   0x6   : > { %p183_p4 = scmp.lt.s32.totalorder (!%p156_p3), %s391_s12, 1  ;;  %v401_v0 = vmov (!%p156_p3), 0.0   ;;  %vm402_vm0 = vmmov (!%p156_p3), 0   ;;  %v200_v1 = vld [vmem:[%s465_s2] sm:$0xff] (!%p156_p3)  ;;  %v403_v2 = vmov (!%p156_p3), 0   ;;  %vm210_vm1 = vcmask (!%p156_p3), 1041408  }
   0x7   : > { %159 = sbr.rel (%p156_p3) target bundleno = 239 (0xef), region = 32  ;;  %343 = vmatprep.subr.bf16.mxu0 (!%p156_p3), %v401_v0  ;;  %345 = vmatprep.mubr.msk.bf16.mxu0 (!%p156_p3), %vm402_vm0, %v401_v0  ;;  %v199_v5 = vld [vmem:[%s464_s1] sm:$0xf] (!%p156_p3)  ;;  %vm206_vm2 = vcmask (!%p156_p3), 31744   ;;  %vm255_vm3 = vcmask (!%p156_p3), 519168  }
   0x8   : > { %376 = vset.pattern.permute.xlu0 (!%p156_p3), %v403_v2 }
   0x9   : > { %203 = vperm.xlu0 (!%p156_p3), %376, %v200_v1  }
   0xe   : > { %s472_s12 = smov (!%p183_p4, %s391_s12), 1 }
   0xf   : > { %s336_s18 = sshll.u32 %s472_s12, 1  ;;  %s337_s24 = sshll.u32 %s472_s12, 2 }
  0x10   : > { %s189_s21 = scalar_lea.vmem %s463_s0, %s336_s18  ;;  %s196_s27 = scalar_lea.vmem %s466_s3, %s337_s24 }
  0x11   : > { %v198_v3 = vld [vmem:[%s189_s21] sm:$0x3] }
  0x12   : > { %v212_v4 = vsel %vm210_vm1, %v198_v3, 0 }
  0x13   : > { %344 = vmatpush3.bf16.msra.mxu0 %v212_v4 }
  0x16   : > { %346 = vmatmul.mubr.msk.bf16.vlgmr.msra.gmra.mrb[0].mxu0 %vm206_vm2, %v199_v5 }
  0x88   : > { %v204_v6 = vpop.permute.xlu0 %203 }
  0xe9   : > { %v248_v7 = vpop.f32.mrb[0].mxu0 }
  0xea   : > { %v249_v8 = vadd.f32 %v248_v7, %v204_v6  ;;  %v347_v9 = vpop.f32.mrb[1].mxu0 }
  0xeb   : > { %v251_v10 = vpop.f32.mrb[2].mxu0 }
  0xec   : > { %v254_v11 = vpack.c.bf16 %v249_v8, %v249_v8  ;;  %v348_v12 = vpop.f32.mrb[3].mxu0 }
  0xee   : > { %256 = vst.msk [vmem:[%s196_s27] sm:$0xf] %vm255_vm3, %v254_v11 }
  0xef PF: > { %s13_s14 = sadd.s32 1, %s399_s14   ;;  %s467_s12 = smov %s395_s13 }
  0xf0   : > { %p10_p5 = scmp.ge.s32.totalorder %s13_s14, 4   ;;  %s468_s13 = smov %s470_s15 }
  0xf2   :  { %12 = sbr.rel (!%p10_p5) target bundleno = 2 (0x2), region = 62 }

</bundles_post_ra>
